<compile_context>
chip_gen: v7x
topology: tpu7x:2x2x1
jax: 0.10.0
libtpu: 0.0.40
codegen_flags: <defaults>
</compile_context>

<pallas_src>
import functools

import jax
import jax.numpy as jnp
from jax.experimental import pallas as pl
from jax.experimental.pallas import tpu as pltpu


def _round_up(x, m):
    return ((x + m - 1) // m) * m


# ----------------------------- Pallas kernel ---------------------------------

def _tpe_kernel(fid_ref, rid_ref, ftab_ref, rtab_ref, wfin_ref, bfin_ref,
                out_ref, *, seq_len):
    # fid_ref : (bt*S, 1)     int32  filler ids for this batch tile
    # rid_ref : (bt*S, 1)     int32  role ids for this batch tile
    # ftab_ref: (Vf_pad, F*R) f32    filler table (squeeze Linear folded in,
    #                                columns repeated R times: col f*R+r == filler[f])
    # rtab_ref: (Vr_pad, F*R) f32    role table tiled F times: col f*R+r == role[r]
    # wfin_ref: (F*R, W)      bf16   final Linear weight (row f*R+r matches torch flatten)
    # bfin_ref: (1, W)        f32    final Linear bias
    # out_ref : (bt, W)       f32
    bt_s = fid_ref.shape[0]
    bt = bt_s // seq_len
    vf = ftab_ref.shape[0]
    vr = rtab_ref.shape[0]
    fr = ftab_ref.shape[1]

    # 1) fused embedding gather: one-hot @ table on the MXU (ids never hit the
    #    zero-padded vocab rows, so this is an exact row select).
    f_iota = jax.lax.broadcasted_iota(jnp.int32, (bt_s, vf), 1)
    r_iota = jax.lax.broadcasted_iota(jnp.int32, (bt_s, vr), 1)
    f_onehot = (fid_ref[...] == f_iota).astype(jnp.float32)
    r_onehot = (rid_ref[...] == r_iota).astype(jnp.float32)
    f_rows = jnp.dot(f_onehot, ftab_ref[...], preferred_element_type=jnp.float32)
    r_rows = jnp.dot(r_onehot, rtab_ref[...], preferred_element_type=jnp.float32)

    # 2) per-position Kronecker product == outer(filler_p, role_p), F-major flatten.
    prod = f_rows * r_rows                                       # (bt*S, F*R)

    # 3) TPR binding: sum over sequence positions.  S == 8 splits exactly along
    #    the f32 sublane tile, so the reshape is layout-free and the reduce runs
    #    on the XLU (different VLIW slot than the MXU chain).
    bound = jnp.sum(prod.reshape(bt, seq_len, fr), axis=1)       # (bt, F*R)

    # 4) final Linear: bf16 operands, f32 accumulation (K = F*R fills the MXU).
    out_ref[...] = (
        jnp.dot(bound.astype(jnp.bfloat16), wfin_ref[...],
                preferred_element_type=jnp.float32)
        + bfin_ref[...]
    )


# -------------------- one-time parameter preparation --------------------------

def prepare_params(params):
    """Hoisted (parameter-load-time) algebraic folds & layout expansion.

    params: dict with
      'filler_emb' [num_fillers, E], 'w_squeeze' [E, F], 'b_squeeze' [F],
      'role_emb'   [num_roles, R],   'w_final'   [F*R, W], 'b_final' [W]
    """
    F = params['w_squeeze'].shape[1]
    R = params['role_emb'].shape[1]
    W = params['w_final'].shape[1]

    # Fold Linear(E, F) into the embedding table (exact), then lane-expand both
    # tables so the in-kernel binding is a single VPU multiply.  Column ordering
    # (f*R + r) matches PyTorch's row-major flatten of the (F, R) outer product.
    filler_tab = params['filler_emb'] @ params['w_squeeze'] + params['b_squeeze']
    filler_tab = jnp.repeat(filler_tab, R, axis=1)               # (Vf, F*R)
    role_tab = jnp.tile(params['role_emb'], (1, F))              # (Vr, F*R)

    # Pad vocabularies to sublane multiples (pad rows are never selected).
    vf_pad = _round_up(filler_tab.shape[0], 8)
    vr_pad = _round_up(role_tab.shape[0], 8)
    filler_tab = jnp.pad(filler_tab, ((0, vf_pad - filler_tab.shape[0]), (0, 0)))
    role_tab = jnp.pad(role_tab, ((0, vr_pad - role_tab.shape[0]), (0, 0)))

    return {
        'filler_tab': filler_tab.astype(jnp.float32),            # (Vf_pad, F*R)
        'role_tab': role_tab.astype(jnp.float32),                # (Vr_pad, F*R)
        'w_final': params['w_final'].astype(jnp.bfloat16),       # (F*R, W) bf16
        'b_final': params['b_final'].reshape(1, W).astype(jnp.float32),
    }


# ------------------------------- forward --------------------------------------

def tensor_product_encoder_forward(filler_ids, role_ids, prepared, *,
                                   batch_tile=128):
    """TensorProductEncoder forward.

    filler_ids, role_ids: int32 [B, S];  prepared: output of prepare_params().
    Returns bound_embeddings [B, W] (float32).

    batch_tile is capped at 128 so per-step intermediates (~16 KiB * bt) stay
    well inside the default scoped VMEM limit on all generations (incl. v7x's
    64 MiB physical VMEM).
    """
    B, S = filler_ids.shape
    FR = prepared['filler_tab'].shape[1]
    W = prepared['w_final'].shape[1]
    vf_pad = prepared['filler_tab'].shape[0]
    vr_pad = prepared['role_tab'].shape[0]

    # Robust batch tiling: never promote a large batch into a single tile; large
    # batches give >= 2 independent "parallel" grid steps.
    bt = min(batch_tile, B)
    b_pad = _round_up(B, bt)
    grid = (b_pad // bt,)

    if b_pad != B:
        pad = ((0, b_pad - B), (0, 0))
        filler_ids = jnp.pad(filler_ids, pad)   # pad rows use valid id 0; dropped below
        role_ids = jnp.pad(role_ids, pad)

    fid = filler_ids.reshape(b_pad * S, 1).astype(jnp.int32)
    rid = role_ids.reshape(b_pad * S, 1).astype(jnp.int32)

    kernel = functools.partial(_tpe_kernel, seq_len=S)

    out = pl.pallas_call(
        kernel,
        out_shape=jax.ShapeDtypeStruct((b_pad, W), jnp.float32),
        grid_spec=pltpu.PrefetchScalarGridSpec(
            num_scalar_prefetch=0,
            grid=grid,
            in_specs=[
                pl.BlockSpec((bt * S, 1), lambda i: (i, 0)),    # filler ids
                pl.BlockSpec((bt * S, 1), lambda i: (i, 0)),    # role ids
                pl.BlockSpec((vf_pad, FR), lambda i: (0, 0)),   # filler table (whole)
                pl.BlockSpec((vr_pad, FR), lambda i: (0, 0)),   # role table (whole)
                pl.BlockSpec((FR, W), lambda i: (0, 0)),        # final W (bf16)
                pl.BlockSpec((1, W), lambda i: (0, 0)),         # final b
            ],
            out_specs=pl.BlockSpec((bt, W), lambda i: (i, 0)),
        ),
        compiler_params=pltpu.CompilerParams(
            dimension_semantics=("parallel",),
        ),
    )(fid, rid, prepared['filler_tab'], prepared['role_tab'],
      prepared['w_final'], prepared['b_final'])

    return out[:B]


# Pure-JAX reference (mirrors the PyTorch module exactly).
def _reference_forward(filler_ids, role_ids, params):
    emb = jnp.take(params['filler_emb'], filler_ids, axis=0)           # (B, S, E)
    fillers = emb @ params['w_squeeze'] + params['b_squeeze']          # (B, S, F)
    roles = jnp.take(params['role_emb'], role_ids, axis=0)             # (B, S, R)
    bound = jnp.einsum('bsf,bsr->bfr', fillers, roles)                 # (B, F, R)
    bound_flat = bound.reshape(bound.shape[0], -1)                     # (B, F*R) f-major
    return bound_flat @ params['w_final'] + params['b_final']          # (B, W)


if __name__ == "__main__":
    # Config (cfg.model.*): num_fillers=50, num_roles=10, filler_dim=32,
    # role_dim=16, embed_squeeze_dim=16, final_layer_width=64, binder='tpr'.
    NUM_FILLERS, NUM_ROLES = 50, 10
    FILLER_DIM, ROLE_DIM = 32, 16
    EMBED_SQUEEZE_DIM = 16
    FINAL_W = 64
    B, S = 2, 8

    key = jax.random.PRNGKey(0)
    k = jax.random.split(key, 8)

    params = {
        'filler_emb': jax.random.normal(k[0], (NUM_FILLERS, EMBED_SQUEEZE_DIM), jnp.float32),
        'w_squeeze':  jax.random.normal(k[1], (EMBED_SQUEEZE_DIM, FILLER_DIM), jnp.float32) * 0.1,
        'b_squeeze':  jax.random.normal(k[2], (FILLER_DIM,), jnp.float32) * 0.1,
        'role_emb':   jax.random.normal(k[3], (NUM_ROLES, ROLE_DIM), jnp.float32),
        'w_final':    jax.random.normal(k[4], (FILLER_DIM * ROLE_DIM, FINAL_W), jnp.float32) * 0.05,
        'b_final':    jax.random.normal(k[5], (FINAL_W,), jnp.float32) * 0.1,
    }

    filler_ids = jax.random.randint(k[6], (B, S), 0, NUM_FILLERS, dtype=jnp.int32)
    role_ids = jax.random.randint(k[7], (B, S), 0, NUM_ROLES, dtype=jnp.int32)

    # One-time parameter preparation (hoisted out of the per-forward path).
    prepared = prepare_params(params)
    prepared = jax.tree_util.tree_map(jax.block_until_ready, prepared)

    out = tensor_product_encoder_forward(filler_ids, role_ids, prepared)
    out = jax.block_until_ready(out)

    ref = _reference_forward(filler_ids, role_ids, params)
    assert out.shape == (B, FINAL_W)
    # bf16 operands (f32 accumulation) on the final matmul -> loosened tolerance.
    assert jnp.allclose(out, ref, atol=5e-2, rtol=2e-2), "mismatch vs reference"

    print("KERNEL_OK")
</pallas_src>

<mosaic_0001>
module attributes {stable_mosaic.version = 11 : i64} {
  func.func @_tpe_kernel(%arg0: i32, %arg1: memref<16x1xi32, #tpu.memory_space<vmem>>, %arg2: memref<16x1xi32, #tpu.memory_space<vmem>>, %arg3: memref<56x512xf32, #tpu.memory_space<vmem>>, %arg4: memref<16x512xf32, #tpu.memory_space<vmem>>, %arg5: memref<512x64xbf16, #tpu.memory_space<vmem>>, %arg6: memref<1x64xf32, #tpu.memory_space<vmem>>, %arg7: memref<2x64xf32, #tpu.memory_space<vmem>>) attributes {dimension_semantics = [#tpu.dimension_semantics<parallel>], iteration_bounds = array<i64: 1>, scalar_prefetch = 0 : i64, scratch_operands = 0 : i64, tpu.core_type = #tpu.core_type<tc>, window_params = [{transform_indices = @transform_0, window_bounds = array<i64: 16, 1>}, {transform_indices = @transform_1, window_bounds = array<i64: 16, 1>}, {pipeline_mode = #tpu.pipeline_mode<synchronous>, transform_indices = @transform_2, window_bounds = array<i64: 56, 512>}, {pipeline_mode = #tpu.pipeline_mode<synchronous>, transform_indices = @transform_3, window_bounds = array<i64: 16, 512>}, {pipeline_mode = #tpu.pipeline_mode<synchronous>, transform_indices = @transform_4, window_bounds = array<i64: 512, 64>}, {pipeline_mode = #tpu.pipeline_mode<synchronous>, transform_indices = @transform_5, window_bounds = array<i64: 1, 64>}, {transform_indices = @transform_6, window_bounds = array<i64: 2, 64>}]} {
    %0 = tpu.iota {dimensions = array<i32: 1>} : vector<16x56xi32>
    %1 = tpu.iota {dimensions = array<i32: 1>} : vector<16x16xi32>
    %c0 = arith.constant 0 : index
    %c0_0 = arith.constant 0 : index
    %2 = vector.load %arg1[%c0, %c0_0] : memref<16x1xi32, #tpu.memory_space<vmem>>, vector<16x1xi32>
    %3 = vector.broadcast %2 : vector<16x1xi32> to vector<16x56xi32>
    %4 = arith.cmpi eq, %3, %0 : vector<16x56xi32>
    %5 = arith.extui %4 : vector<16x56xi1> to vector<16x56xi32>
    %6 = arith.sitofp %5 : vector<16x56xi32> to vector<16x56xf32>
    %c0_1 = arith.constant 0 : index
    %c0_2 = arith.constant 0 : index
    %7 = vector.load %arg2[%c0_1, %c0_2] : memref<16x1xi32, #tpu.memory_space<vmem>>, vector<16x1xi32>
    %8 = vector.broadcast %7 : vector<16x1xi32> to vector<16x16xi32>
    %9 = arith.cmpi eq, %8, %1 : vector<16x16xi32>
    %10 = arith.extui %9 : vector<16x16xi1> to vector<16x16xi32>
    %11 = arith.sitofp %10 : vector<16x16xi32> to vector<16x16xf32>
    %c0_3 = arith.constant 0 : index
    %c0_4 = arith.constant 0 : index
    %12 = vector.load %arg3[%c0_3, %c0_4] : memref<56x512xf32, #tpu.memory_space<vmem>>, vector<56x512xf32>
    %cst = arith.constant dense<0.000000e+00> : vector<16x512xf32>
    %13 = tpu.matmul %6, %12, %cst {dimension_numbers = #tpu.dot_dimension_numbers<[1], [0], [0], [1], [0, 0, 1, 1], [], []>} : vector<16x56xf32>, vector<56x512xf32>, vector<16x512xf32> -> vector<16x512xf32>
    %c0_5 = arith.constant 0 : index
    %c0_6 = arith.constant 0 : index
    %14 = vector.load %arg4[%c0_5, %c0_6] : memref<16x512xf32, #tpu.memory_space<vmem>>, vector<16x512xf32>
    %cst_7 = arith.constant dense<0.000000e+00> : vector<16x512xf32>
    %15 = tpu.matmul %11, %14, %cst_7 {dimension_numbers = #tpu.dot_dimension_numbers<[1], [0], [0], [1], [0, 0, 1, 1], [], []>} : vector<16x16xf32>, vector<16x512xf32>, vector<16x512xf32> -> vector<16x512xf32>
    %16 = arith.mulf %13, %15 : vector<16x512xf32>
    %17 = vector.shape_cast %16 : vector<16x512xf32> to vector<2x8x512xf32>
    %cst_8 = arith.constant dense<0.000000e+00> : vector<2x512xf32>
    %18 = vector.multi_reduction <add>, %17, %cst_8 [1] : vector<2x8x512xf32> to vector<2x512xf32>
    %19 = arith.truncf %18 : vector<2x512xf32> to vector<2x512xbf16>
    %c0_9 = arith.constant 0 : index
    %c0_10 = arith.constant 0 : index
    %20 = vector.load %arg5[%c0_9, %c0_10] : memref<512x64xbf16, #tpu.memory_space<vmem>>, vector<512x64xbf16>
    %cst_11 = arith.constant dense<0.000000e+00> : vector<2x64xf32>
    %21 = tpu.matmul %19, %20, %cst_11 {dimension_numbers = #tpu.dot_dimension_numbers<[1], [0], [0], [1], [0, 0, 1, 1], [], []>} : vector<2x512xbf16>, vector<512x64xbf16>, vector<2x64xf32> -> vector<2x64xf32>
    %c0_12 = arith.constant 0 : index
    %c0_13 = arith.constant 0 : index
    %22 = vector.load %arg6[%c0_12, %c0_13] : memref<1x64xf32, #tpu.memory_space<vmem>>, vector<1x64xf32>
    %23 = vector.broadcast %22 : vector<1x64xf32> to vector<2x64xf32>
    %24 = arith.addf %21, %23 : vector<2x64xf32>
    %c0_14 = arith.constant 0 : index
    %c0_15 = arith.constant 0 : index
    %25 = vector.load %arg7[%c0_14, %c0_15] : memref<2x64xf32, #tpu.memory_space<vmem>>, vector<2x64xf32>
    tpu.vector_store %arg7[%c0_14, %c0_15], %24 {strides = array<i32>} : memref<2x64xf32, #tpu.memory_space<vmem>>, vector<2x64xf32>,
    return
  }
  func.func @transform_0(%arg0: i32) -> (i32, i32) {
    %c0_i32 = arith.constant 0 : i32
    %c0_i32_0 = arith.constant 0 : i32
    return %arg0, %c0_i32 : i32, i32
  }
  func.func @transform_1(%arg0: i32) -> (i32, i32) {
    %c0_i32 = arith.constant 0 : i32
    %c0_i32_0 = arith.constant 0 : i32
    return %arg0, %c0_i32 : i32, i32
  }
  func.func @transform_2(%arg0: i32) -> (i32, i32) {
    %c0_i32 = arith.constant 0 : i32
    %c0_i32_0 = arith.constant 0 : i32
    %c0_i32_1 = arith.constant 0 : i32
    return %c0_i32, %c0_i32_0 : i32, i32
  }
  func.func @transform_3(%arg0: i32) -> (i32, i32) {
    %c0_i32 = arith.constant 0 : i32
    %c0_i32_0 = arith.constant 0 : i32
    %c0_i32_1 = arith.constant 0 : i32
    return %c0_i32, %c0_i32_0 : i32, i32
  }
  func.func @transform_4(%arg0: i32) -> (i32, i32) {
    %c0_i32 = arith.constant 0 : i32
    %c0_i32_0 = arith.constant 0 : i32
    %c0_i32_1 = arith.constant 0 : i32
    return %c0_i32, %c0_i32_0 : i32, i32
  }
  func.func @transform_5(%arg0: i32) -> (i32, i32) {
    %c0_i32 = arith.constant 0 : i32
    %c0_i32_0 = arith.constant 0 : i32
    %c0_i32_1 = arith.constant 0 : i32
    return %c0_i32, %c0_i32_0 : i32, i32
  }
  func.func @transform_6(%arg0: i32) -> (i32, i32) {
    %c0_i32 = arith.constant 0 : i32
    %c0_i32_0 = arith.constant 0 : i32
    return %arg0, %c0_i32 : i32, i32
  }
}

</mosaic_0001>

<bundles_post_ra>
// kernel: tpu_custom_call.1
= control target key start
LH: loop header
LB: loop body
LE: loop exit
PB: predicated region body
PF: predicated region fallthrough
CT: control target
= control target key end

     0   :  { %v1047_v2 = vmov 0   ;;  %v1048_v15 = vmov 0.0   ;;  %s1332_s0 = inlined_call_operand.vmem [shape: s32[16,1], index: 0, kind: input, shape index: {}]   ;;  %s1333_s1 = inlined_call_operand.vmem [shape: s32[16,1], index: 1, kind: input, shape index: {}]   ;;  %s1334_s2 = inlined_call_operand.vmem [shape: f32[56,512], index: 2, kind: input, shape index: {}]   ;;  %s1335_s3 = inlined_call_operand.vmem [shape: f32[16,512], index: 3, kind: input, shape index: {}]   ;;  %s1336_s4 = inlined_call_operand.vmem [shape: bf16[512,64], index: 4, kind: input, shape index: {}]   ;;  %s1337_s5 = inlined_call_operand.vmem [shape: f32[1,64], index: 5, kind: input, shape index: {}]   ;;  %s1338_s6 = inlined_call_operand.hbm [shape: f32[2,64], index: 6, kind: output, shape index: {}]  }
   0x1   :  { %v27_v0 = vld [vmem:[%s1332_s0] sm:$0xff]  ;;  %989 = vset.pattern.permute.xlu0 %v1047_v2  ;;  %990 = vset.pattern.permute.xlu1 %v1047_v2  ;;  %v28_v3 = vld [vmem:[%s1332_s0 + $0x8] sm:$0xff]  ;;  %v58_v10 = vld [vmem:[%s1334_s2 + $0x18] sm:$0xff] }
   0x2   :  { %v41_v1 = vld [vmem:[%s1333_s1] sm:$0xff]  ;;  %v42_v4 = vld [vmem:[%s1333_s1 + $0x8] sm:$0xff]  ;;  %30 = vperm.xlu0 %989, %v27_v0   ;;  %v62_v12 = vld [vmem:[%s1334_s2 + $0x38] sm:$0xff]  ;;  %154 = vmatprep.mubr.f32.mxu0 %v1048_v15 }
   0x3   :  { %v56_v5 = vld [vmem:[%s1334_s2 + $0x8] sm:$0xff]  ;;  %44 = vperm.xlu1 %990, %v41_v1   ;;  %v55_v8 = vld [vmem:[%s1334_s2] sm:$0xff]  ;;  %v57_v13 = vld [vmem:[%s1334_s2 + $0x10] sm:$0xff]  ;;  %231 = vmatprep.mubr.f32.mxu1 %v1048_v15  ;;  %v966_v16 = vpack.c.bf16 %v62_v12, %v58_v10 }
   0x4   :  { %v60_v6 = vld [vmem:[%s1334_s2 + $0x28] sm:$0xff]  ;;  %v59_v9 = vld [vmem:[%s1334_s2 + $0x20] sm:$0xff]  ;;  %v61_v14 = vld [vmem:[%s1334_s2 + $0x30] sm:$0xff] }
   0x5   :  { %v954_v7 = vpack.c.bf16 %v60_v6, %v56_v5  ;;  %v956_v11 = vpack.c.bf16 %v59_v9, %v55_v8  ;;  %v968_v17 = vpack.c.bf16 %v61_v14, %v57_v13  ;;  %v64_v18 = vld [vmem:[%s1334_s2 + $0x48] sm:$0xff]  ;;  %v63_v20 = vld [vmem:[%s1334_s2 + $0x40] sm:$0xff]  ;;  %v66_v23 = vld [vmem:[%s1334_s2 + $0x58] sm:$0xff]  ;;  %967 = vmatprep.subr.bf16.mxu1 %v966_v16 }
   0x6   :  { %v68_v19 = vld [vmem:[%s1334_s2 + $0x68] sm:$0xff]  ;;  %v67_v22 = vld [vmem:[%s1334_s2 + $0x60] sm:$0xff]  ;;  %v70_v24 = vld [vmem:[%s1334_s2 + $0x78] sm:$0xff]  ;;  %33 = vperm.xlu0 %989, %v28_v3  }
   0x7   :  { %955 = vmatprep.subr.bf16.mxu0 %v954_v7  ;;  %v958_v21 = vpack.c.bf16 %v68_v19, %v64_v18  ;;  %47 = vperm.xlu1 %990, %v42_v4   ;;  %v960_v25 = vpack.c.bf16 %v67_v22, %v63_v20  ;;  %v970_v26 = vpack.c.bf16 %v70_v24, %v66_v23  ;;  %v65_v27 = vld [vmem:[%s1334_s2 + $0x50] sm:$0xff]  ;;  %v72_v29 = vld [vmem:[%s1334_s2 + $0x88] sm:$0xff]  ;;  %v71_v31 = vld [vmem:[%s1334_s2 + $0x80] sm:$0xff] }
   0x8   :  { %957 = vmatpush1.bf16.msra.mxu0 %v956_v11  ;;  %v69_v28 = vld [vmem:[%s1334_s2 + $0x70] sm:$0xff]  ;;  %v76_v30 = vld [vmem:[%s1334_s2 + $0xa8] sm:$0xff]  ;;  %v75_v32 = vld [vmem:[%s1334_s2 + $0xa0] sm:$0xff]  ;;  %969 = vmatpush1.bf16.msra.mxu1 %v968_v17 }
   0x9   :  { %959 = vmatprep.subr.bf16.mxu0 %v958_v21  ;;  %v972_v33 = vpack.c.bf16 %v69_v28, %v65_v27  ;;  %v962_v34 = vpack.c.bf16 %v76_v30, %v72_v29  ;;  %v74_v35 = vld [vmem:[%s1334_s2 + $0x98] sm:$0xff]  ;;  %971 = vmatprep.subr.bf16.mxu1 %v970_v26  ;;  %v964_v37 = vpack.c.bf16 %v75_v32, %v71_v31  ;;  %v73_v39 = vld [vmem:[%s1334_s2 + $0x90] sm:$0xff]  ;;  %v80_v41 = vld [vmem:[%s1334_s2 + $0xc8] sm:$0xff] }
   0xa   :  { %v78_v36 = vld [vmem:[%s1334_s2 + $0xb8] sm:$0xff]  ;;  %v77_v40 = vld [vmem:[%s1334_s2 + $0xb0] sm:$0xff]  ;;  %v245_v42 = vld [vmem:[%s1335_s3 + $0x8] sm:$0xff] }
   0xb   :  { %v974_v38 = vpack.c.bf16 %v78_v36, %v74_v35  ;;  %v249_v43 = vld [vmem:[%s1335_s3 + $0x28] sm:$0xff]  ;;  %v976_v44 = vpack.c.bf16 %v77_v40, %v73_v39  ;;  %v79_v45 = vld [vmem:[%s1334_s2 + $0xc0] sm:$0xff]  ;;  %v82_v46 = vld [vmem:[%s1334_s2 + $0xd8] sm:$0xff] }
   0xc   :  { %961 = vmatpush1.bf16.msra.mxu0 %v960_v25  ;;  %973 = vmatpush1.bf16.msra.mxu1 %v972_v33  ;;  %v247_v47 = vld [vmem:[%s1335_s3 + $0x18] sm:$0xff]  ;;  %v978_v49 = vpack.c.bf16 %v249_v43, %v245_v42  ;;  %v81_v50 = vld [vmem:[%s1334_s2 + $0xd0] sm:$0xff] }
   0xd   :  { %963 = vmatprep.subr.bf16.mxu0 %v962_v34  ;;  %975 = vmatprep.subr.bf16.mxu1 %v974_v38  ;;  %v251_v48 = vld [vmem:[%s1335_s3 + $0x38] sm:$0xff] }
   0xe   :  { %v982_v51 = vpack.c.bf16 %v251_v48, %v247_v47 }
  0x10   :  { %965 = vmatpush1.bf16.msra.mxu0 %v964_v37  ;;  %977 = vmatpush1.bf16.msra.mxu1 %v976_v44 }
  0x11   :  { %102 = vmatprep.subr.mxu0 %v80_v41  ;;  %179 = vmatprep.subr.mxu1 %v82_v46 }
  0x14   :  { %103 = vmatpush1.msra.mxu0 %v79_v45  ;;  %180 = vmatpush1.msra.mxu1 %v81_v50 }
  0x15   :  { %979 = vmatprep.subr.bf16.mxu0 %v978_v49  ;;  %983 = vmatprep.subr.bf16.mxu1 %v982_v51 }
  0x16   :  { %11 = vsyncpa [#allocation3], 0  ;;  %v25_v52 = vlaneseq  ;;  %v244_v53 = vld [vmem:[%s1335_s3] sm:$0xff]  ;;  %v246_v56 = vld [vmem:[%s1335_s3 + $0x10] sm:$0xff]  ;;  %vm83_vm0 = vcmask 457728   ;;  %vm252_vm4 = vcmask 130048  }
  0x17   :  { %v248_v55 = vld [vmem:[%s1335_s3 + $0x20] sm:$0xff]  ;;  %v250_v57 = vld [vmem:[%s1335_s3 + $0x30] sm:$0xff]  ;;  %v995_v8 = vld [vmem:[%s1336_s4 + $0x48] sm:$0xff]   ;;  %vm564_vm6 = vcmask 1041409   ;;  %s1049_s30 = smov [#allocation2]   ;;  %vm849_vm7 = vcmask 517120  }
  0x18   :  { %v26_v54 = vand.u32 127, %v25_v52  ;;  %v980_v59 = vpack.c.bf16 %v248_v55, %v244_v53  ;;  %v984_v60 = vpack.c.bf16 %v250_v57, %v246_v56  ;;  %v991_v4 = vld [vmem:[%s1336_s4 + $0x40] sm:$0xff]   ;;  %v996_v9 = vld [vmem:[%s1336_s4 + $0xc8] sm:$0xff]   ;;  %v999_v12 = vld [vmem:[%s1336_s4 + $0x50] sm:$0xff]   ;;  %s857_s7 = sshll.u32 %s1049_s30, 4  ;;  %s858_s7 = int_to_ptr.vmem [resolvable:$true] %s857_s7 }
  0x19   :  { %v992_v5 = vld [vmem:[%s1336_s4 + $0xc0] sm:$0xff]   ;;  %v997_v10 = vld [vmem:[%s1336_s4 + $0x8] sm:$0xff]   ;;  %v1000_v13 = vld [vmem:[%s1336_s4 + $0xd0] sm:$0xff]   ;;  %s1023_s8 = scalar_lea.vmem %s858_s7, 32  ;;  %p1028_p1 = scmp.lt.s32.totalorder %s858_s7, %s858_s7 }
  0x1a   :  { %v993_v6 = vld [vmem:[%s1336_s4] sm:$0xff]   ;;  %v998_v11 = vld [vmem:[%s1336_s4 + $0x88] sm:$0xff]   ;;  %v1001_v14 = vld [vmem:[%s1336_s4 + $0x10] sm:$0xff]   ;;  %p1024_p0 = scmp.ne.s32.totalorder %s858_s7, %s1023_s8  ;;  %p1029_p2 = scmp.lt.s32.totalorder %s1023_s8, %s1023_s8 }
  0x1b   :  { %v994_v7 = vld [vmem:[%s1336_s4 + $0x80] sm:$0xff]   ;;  %v1003_v16 = vld [vmem:[%s1336_s4 + $0x58] sm:$0xff]   ;;  %v1011_v24 = vld [vmem:[%s1336_s4 + $0x68] sm:$0xff]  }
  0x1c   :  { %v1004_v17 = vld [vmem:[%s1336_s4 + $0xd8] sm:$0xff]   ;;  %v1007_v20 = vld [vmem:[%s1336_s4 + $0x60] sm:$0xff]   ;;  %v1012_v25 = vld [vmem:[%s1336_s4 + $0xe8] sm:$0xff]   ;;  %p1030_p3 = por %p1029_p2, %p1028_p1 }
  0x1d   :  { %v1005_v18 = vld [vmem:[%s1336_s4 + $0x18] sm:$0xff]   ;;  %v1008_v21 = vld [vmem:[%s1336_s4 + $0xe0] sm:$0xff]   ;;  %v1013_v26 = vld [vmem:[%s1336_s4 + $0x28] sm:$0xff]  }
  0x1e   :  { %v1006_v19 = vld [vmem:[%s1336_s4 + $0x98] sm:$0xff]   ;;  %v1009_v22 = vld [vmem:[%s1336_s4 + $0x20] sm:$0xff]   ;;  %v1014_v27 = vld [vmem:[%s1336_s4 + $0xa8] sm:$0xff]   ;;  %p1031_p4 = pnand %p1030_p3, %p1024_p0 }
  0x1f   :  { %v1010_v23 = vld [vmem:[%s1336_s4 + $0xa0] sm:$0xff]   ;;  %v1015_v28 = vld [vmem:[%s1336_s4 + $0x70] sm:$0xff]   ;;  %v1019_v32 = vld [vmem:[%s1336_s4 + $0x78] sm:$0xff]  }
  0x20   :  { %v1016_v29 = vld [vmem:[%s1336_s4 + $0xf0] sm:$0xff]   ;;  %v1020_v33 = vld [vmem:[%s1336_s4 + $0xf8] sm:$0xff]  }
  0x21   :  { %v1017_v30 = vld [vmem:[%s1336_s4 + $0x30] sm:$0xff]   ;;  %v1021_v34 = vld [vmem:[%s1336_s4 + $0x38] sm:$0xff]  }
  0x22   :  { %v1018_v31 = vld [vmem:[%s1336_s4 + $0xb0] sm:$0xff]   ;;  %v1022_v35 = vld [vmem:[%s1336_s4 + $0xb8] sm:$0xff]  }
  0x81   :  { %v31_v58 = vpop.permute.xlu0 %30 }
  0x82   :  { %vm35_vm1 = vcmp.eq.s32.totalorder %v31_v58, %v26_v54  ;;  %v45_v62 = vpop.permute.xlu1 %44 }
  0x83   :  { %v865_v61 = vsel %vm35_vm1, 1.0, %v1048_v15  ;;  %vm49_vm2 = vcmp.eq.s32.totalorder %v45_v62, %v26_v54 }
  0x84   :  { %869 = vmatmul.mubr.msk.f32.vlgmr.msra.gmra.mrb[0].mxu0 %vm83_vm0, %v865_v61  ;;  %871 = vmatmul.mubr.msk.f32.vlgmr.msra.gmra.mrb[0].mxu1 %vm83_vm0, %v865_v61  ;;  %v867_v1 = vsel %vm49_vm2, 1.0, %v1048_v15 }
  0x85   :  { %981 = vmatpush1.bf16.msra.mxu0 %v980_v59  ;;  %v34_v63 = vpop.permute.xlu0 %33  ;;  %985 = vmatpush1.bf16.msra.mxu1 %v984_v60 }
  0x86   :  { %vm36_vm3 = vcmp.eq.s32.totalorder %v34_v63, %v26_v54  ;;  %160 = vmatprep.mubr.f32.mxu0 %v1048_v15  ;;  %237 = vmatprep.mubr.f32.mxu1 %v1048_v15  ;;  %v48_v2 = vpop.permute.xlu1 %47 }
  0x87   :  { %v866_v0 = vsel %vm36_vm3, 1.0, %v1048_v15  ;;  %vm50_vm5 = vcmp.eq.s32.totalorder %v48_v2, %v26_v54  ;;  %910 = vmatprep.subr.bf16.mxu0 %v991_v4  ;;  %932 = vmatprep.subr.bf16.mxu1 %v992_v5 }
  0x88   :  { %870 = vmatmul.mubr.msk.f32.gmra.mrb[2].mxu0 %vm83_vm0, %v866_v0  ;;  %872 = vmatmul.mubr.msk.f32.gmra.mrb[2].mxu1 %vm83_vm0, %v866_v0  ;;  %v868_v3 = vsel %vm50_vm5, 1.0, %v1048_v15 }
  0x89   :  { %323 = vmatprep.mubr.f32.mxu0 %v1048_v15  ;;  %400 = vmatprep.mubr.f32.mxu1 %v1048_v15 }
  0x8c   :  { %873 = vmatmul.mubr.msk.f32.vlgmr.msra.gmra.mrb[4].mxu0 %vm252_vm4, %v867_v1  ;;  %875 = vmatmul.mubr.msk.f32.vlgmr.msra.gmra.mrb[4].mxu1 %vm252_vm4, %v867_v1 }
  0x8d   :  { %329 = vmatprep.mubr.f32.mxu0 %v1048_v15  ;;  %406 = vmatprep.mubr.f32.mxu1 %v1048_v15  ;;  %v1002_v15 = vld [vmem:[%s1336_s4 + $0x90] sm:$0xff]  }
  0x8e   :  { %911 = vmatpush3.bf16.msra.mxu0 %v993_v6  ;;  %933 = vmatpush3.bf16.msra.mxu1 %v994_v7 }
  0x8f   :  { %912 = vmatprep.subr.bf16.mxu0 %v995_v8  ;;  %934 = vmatprep.subr.bf16.mxu1 %v996_v9 }
  0x90   :  { %874 = vmatmul.mubr.msk.f32.gmra.mrb[6].mxu0 %vm252_vm4, %v868_v3  ;;  %876 = vmatmul.mubr.msk.f32.gmra.mrb[6].mxu1 %vm252_vm4, %v868_v3 }
  0x92   :  { %913 = vmatpush3.bf16.msra.mxu0 %v997_v10  ;;  %935 = vmatpush3.bf16.msra.mxu1 %v998_v11 }
  0x93   :  { %914 = vmatprep.subr.bf16.mxu0 %v999_v12  ;;  %936 = vmatprep.subr.bf16.mxu1 %v1000_v13 }
  0x96   :  { %915 = vmatpush3.bf16.msra.mxu0 %v1001_v14  ;;  %937 = vmatpush3.bf16.msra.mxu1 %v1002_v15 }
  0x97   :  { %916 = vmatprep.subr.bf16.mxu0 %v1003_v16  ;;  %938 = vmatprep.subr.bf16.mxu1 %v1004_v17 }
  0x9a   :  { %917 = vmatpush3.bf16.msra.mxu0 %v1005_v18  ;;  %939 = vmatpush3.bf16.msra.mxu1 %v1006_v19 }
  0x9b   :  { %918 = vmatprep.subr.bf16.mxu0 %v1007_v20  ;;  %940 = vmatprep.subr.bf16.mxu1 %v1008_v21 }
  0x9e   :  { %919 = vmatpush3.bf16.msra.mxu0 %v1009_v22  ;;  %941 = vmatpush3.bf16.msra.mxu1 %v1010_v23 }
  0x9f   :  { %920 = vmatprep.subr.bf16.mxu0 %v1011_v24  ;;  %942 = vmatprep.subr.bf16.mxu1 %v1012_v25 }
  0xa2   :  { %921 = vmatpush3.bf16.msra.mxu0 %v1013_v26  ;;  %943 = vmatpush3.bf16.msra.mxu1 %v1014_v27 }
  0xa3   :  { %922 = vmatprep.subr.bf16.mxu0 %v1015_v28  ;;  %944 = vmatprep.subr.bf16.mxu1 %v1016_v29 }
  0xa6   :  { %923 = vmatpush3.bf16.msra.mxu0 %v1017_v30  ;;  %945 = vmatpush3.bf16.msra.mxu1 %v1018_v31 }
  0xa7   :  { %924 = vmatprep.subr.bf16.mxu0 %v1019_v32  ;;  %946 = vmatprep.subr.bf16.mxu1 %v1020_v33 }
  0xaa   :  { %925 = vmatpush3.bf16.msra.mxu0 %v1021_v34  ;;  %947 = vmatpush3.bf16.msra.mxu1 %v1022_v35 }
 0x157   :  { %v156_v36 = vpop.f32.mrb[0].mxu0  ;;  %v233_v37 = vpop.f32.mrb[0].mxu1 }
 0x158   :  { %v158_v38 = vpop.f32.mrb[1].mxu0  ;;  %v235_v39 = vpop.f32.mrb[1].mxu1 }
 0x15b   :  { %v162_v40 = vpop.f32.mrb[2].mxu0  ;;  %v239_v41 = vpop.f32.mrb[2].mxu1 }
 0x15c   :  { %v164_v42 = vpop.f32.mrb[3].mxu0  ;;  %v241_v43 = vpop.f32.mrb[3].mxu1 }
 0x15f   :  { %v325_v44 = vpop.f32.mrb[4].mxu0  ;;  %v402_v45 = vpop.f32.mrb[4].mxu1 }
 0x160   :  { %v413_v46 = vmul.f32 %v325_v44, %v156_v36  ;;  %v415_v47 = vmul.f32 %v402_v45, %v233_v37  ;;  %v327_v48 = vpop.f32.mrb[5].mxu0  ;;  %v404_v49 = vpop.f32.mrb[5].mxu1 }
 0x161   :  { %v414_v50 = vmul.f32 %v327_v48, %v158_v38  ;;  %v416_v51 = vmul.f32 %v404_v49, %v235_v39 }
 0x162   :  { %v421_v52 = vrot.slane %v413_v46, 4  ;;  %v433_v53 = vrot.slane %v415_v47, 4 }
 0x163   :  { %v427_v54 = vrot.slane %v414_v50, 4  ;;  %v439_v55 = vrot.slane %v416_v51, 4  ;;  %v331_v56 = vpop.f32.mrb[6].mxu0  ;;  %v408_v57 = vpop.f32.mrb[6].mxu1 }
 0x164   :  { %v422_v58 = vadd.f32 %v421_v52, %v413_v46  ;;  %v434_v59 = vadd.f32 %v433_v53, %v415_v47  ;;  %v417_v60 = vmul.f32 %v331_v56, %v162_v40  ;;  %v419_v61 = vmul.f32 %v408_v57, %v239_v41  ;;  %v333_v62 = vpop.f32.mrb[7].mxu0  ;;  %v410_v63 = vpop.f32.mrb[7].mxu1 }
 0x165   :  { %v428_v0 = vadd.f32 %v427_v54, %v414_v50  ;;  %v440_v1 = vadd.f32 %v439_v55, %v416_v51  ;;  %v418_v2 = vmul.f32 %v333_v62, %v164_v42  ;;  %v420_v3 = vmul.f32 %v410_v63, %v241_v43 }
 0x166   :  { %v423_v4 = vrot.slane %v422_v58, 2  ;;  %v435_v5 = vrot.slane %v434_v59, 2  ;;  %v445_v6 = vrot.slane %v417_v60, 4  ;;  %v457_v7 = vrot.slane %v419_v61, 4 }
 0x167   :  { %v429_v8 = vrot.slane %v428_v0, 2  ;;  %v441_v9 = vrot.slane %v440_v1, 2  ;;  %v451_v10 = vrot.slane %v418_v2, 4  ;;  %v463_v11 = vrot.slane %v420_v3, 4 }
 0x168   :  { %v424_v12 = vadd.f32 %v423_v4, %v422_v58  ;;  %v436_v13 = vadd.f32 %v435_v5, %v434_v59  ;;  %v446_v14 = vadd.f32 %v445_v6, %v417_v60  ;;  %v458_v15 = vadd.f32 %v457_v7, %v419_v61  ;;  %v877_v6 = vld [vmem:[%s1337_s5] ss:$0 sm:$0xff] }
 0x169   :  { %v430_v16 = vadd.f32 %v429_v8, %v428_v0  ;;  %v442_v17 = vadd.f32 %v441_v9, %v440_v1  ;;  %v452_v18 = vadd.f32 %v451_v10, %v418_v2  ;;  %v464_v19 = vadd.f32 %v463_v11, %v420_v3 }
 0x16a   :  { %v425_v20 = vrot.slane %v424_v12, 1  ;;  %v437_v21 = vrot.slane %v436_v13, 1  ;;  %v447_v22 = vrot.slane %v446_v14, 2  ;;  %v459_v23 = vrot.slane %v458_v15, 2 }
 0x16b   :  { %v431_v24 = vrot.slane %v430_v16, 1  ;;  %v443_v25 = vrot.slane %v442_v17, 1  ;;  %v453_v26 = vrot.slane %v452_v18, 2  ;;  %v465_v27 = vrot.slane %v464_v19, 2 }
 0x16c   :  { %v426_v28 = vadd.f32 %v425_v20, %v424_v12  ;;  %v438_v29 = vadd.f32 %v437_v21, %v436_v13  ;;  %v448_v30 = vadd.f32 %v447_v22, %v446_v14  ;;  %v460_v31 = vadd.f32 %v459_v23, %v458_v15 }
 0x16d   :  { %v432_v32 = vadd.f32 %v431_v24, %v430_v16  ;;  %v444_v33 = vadd.f32 %v443_v25, %v442_v17  ;;  %v454_v34 = vadd.f32 %v453_v26, %v452_v18  ;;  %v466_v35 = vadd.f32 %v465_v27, %v464_v19 }
 0x16e   :  { %v449_v36 = vrot.slane %v448_v30, 1  ;;  %v461_v37 = vrot.slane %v460_v31, 1  ;;  %v469_v40 = vpack.c.bf16 %v426_v28, %v426_v28  ;;  %v471_v41 = vpack.c.bf16 %v438_v29, %v438_v29 }
 0x16f   :  { %v455_v38 = vrot.slane %v454_v34, 1  ;;  %v467_v39 = vrot.slane %v466_v35, 1  ;;  %v470_v44 = vpack.c.bf16 %v432_v32, %v432_v32  ;;  %v472_v45 = vpack.c.bf16 %v444_v33, %v444_v33 }
 0x170   :  { %v450_v42 = vadd.f32 %v449_v36, %v448_v30  ;;  %v462_v43 = vadd.f32 %v461_v37, %v460_v31  ;;  %v556_v52 = vunpack.c.l.b16 %v469_v40  ;;  %v558_v53 = vunpack.c.l.b16 %v471_v41 }
 0x171   :  { %v456_v46 = vadd.f32 %v455_v38, %v454_v34  ;;  %v468_v47 = vadd.f32 %v467_v39, %v466_v35  ;;  %v557_v56 = vunpack.c.l.b16 %v470_v44  ;;  %v559_v57 = vunpack.c.l.b16 %v472_v45 }
 0x172   :  { %v473_v48 = vpack.c.bf16 %v450_v42, %v450_v42  ;;  %v475_v49 = vpack.c.bf16 %v462_v43, %v462_v43 }
 0x173   :  { %v474_v50 = vpack.c.bf16 %v456_v46, %v456_v46  ;;  %v476_v51 = vpack.c.bf16 %v468_v47, %v468_v47 }
 0x174   :  { %v560_v54 = vunpack.c.l.b16 %v473_v48  ;;  %v562_v55 = vunpack.c.l.b16 %v475_v49 }
 0x175   :  { %v561_v58 = vunpack.c.l.b16 %v474_v50  ;;  %v563_v59 = vunpack.c.l.b16 %v476_v51 }
 0x176   :  { %v565_v60 = vsel %vm564_vm6, %v560_v54, %v556_v52  ;;  %v567_v61 = vsel %vm564_vm6, %v562_v55, %v558_v53 }
 0x177   :  { %v566_v62 = vsel %vm564_vm6, %v561_v58, %v557_v56  ;;  %v568_v63 = vsel %vm564_vm6, %v563_v59, %v559_v57  ;;  %v569_v2 = vpack.c.b16 %v565_v60, %v565_v60  ;;  %v571_v3 = vpack.c.b16 %v567_v61, %v567_v61 }
 0x178   :  { %v570_v0 = vpack.c.b16 %v566_v62, %v566_v62  ;;  %v572_v1 = vpack.c.b16 %v568_v63, %v568_v63 }
 0x17a   :  { %801 = vmatprep.mubr.bf16.mxu0 %v570_v0  ;;  %841 = vmatprep.mubr.bf16.mxu1 %v572_v1 }
 0x17b   :  { %802 = vmatmul.mubr.bf16.vlgmr.msra.gmra.mrb[8].mxu0 %v569_v2  ;;  %842 = vmatmul.mubr.bf16.vlgmr.msra.gmra.mrb[8].mxu1 %v571_v3 }
 0x24e   :  { %v926_v4 = vpop.f32.mrb[8].mxu0  ;;  %v948_v5 = vpop.f32.mrb[8].mxu1 }
 0x24f   :  { %v927_v7 = vpop.f32.mrb[9].mxu0  ;;  %v949_v8 = vpop.f32.mrb[9].mxu1 }
 0x250   :  { %v928_v9 = vadd.f32 %v927_v7, %v926_v4  ;;  %v950_v10 = vadd.f32 %v949_v8, %v948_v5  ;;  %v929_v11 = vpop.f32.mrb[10].mxu0  ;;  %v951_v12 = vpop.f32.mrb[10].mxu1 }
 0x251   :  { %v930_v13 = vpop.f32.mrb[11].mxu0  ;;  %v952_v14 = vpop.f32.mrb[11].mxu1 }
 0x252   :  { %v804_v15 = vadd.f32 %v928_v9, %v877_v6 }
 0x254   :  { %v844_v16 = vadd.f32 %v950_v10, %v804_v15 }
 0x256   :  { %850 = vst.msk [vmem:[#allocation2] sm:$0x3] %vm849_vm7, %v844_v16 }
 0x257   :  { %1034 = shalt.err (!%p1031_p4)
}
 0x258   :  { %s1035_s10 = scalar_lea.hbm %s1338_s6, 32 }
 0x259   :  { %p1036_p5 = scmp.ne.s32.totalorder %s1338_s6, %s1035_s10  ;;  %p1039_p6 = scmp.lt.u32.totalorder %s1035_s10, %s1338_s6 }
 0x25b   :  { %p1041_p7 = pnand %p1039_p6, %p1036_p5 }
 0x25d   :  { %1044 = shalt.err (!%p1041_p7)
}
 0x25e   :  { %860 = dma.vmem_to_hbm [thread:$0]  %s858_s7, 32, %s1338_s6, [#allocation3]  }
 0x25f   :  { %1045 = dma.done.wait [#allocation3], 32  }
 0x260   :  { %1046 = vsyncadd [#allocation3], 4294967264 }
 0x261   :  { %864 = vsyncpa [#allocation3], 1 }

</bundles_post_ra>
